<compile_context>
chip_gen: v6e
topology: v6e:2x2x1
jax: 0.10.0
libtpu: 0.0.40
codegen_flags: <defaults>
</compile_context>

<pallas_src>
import functools

import jax
import jax.numpy as jnp
from jax.experimental import pallas as pl
from jax.experimental.pallas import tpu as pltpu  # noqa: F401  (TPU backend)


def _mlp_fused_kernel(*refs, num_layers):
    """refs = (x_ref, w0_ref, b0_ref, w1_ref, b1_ref, ..., o_ref).

    Computes the full MLP with intermediates kept in registers/VMEM; ReLU is
    applied after every layer except the last (matches the PyTorch module).
    """
    x_ref = refs[0]
    o_ref = refs[-1]

    h = x_ref[...].astype(jnp.float32)
    for i in range(num_layers):
        w = refs[1 + 2 * i][...]
        b = refs[2 + 2 * i][...]          # (1, N) — broadcasts over batch
        h = jnp.dot(h, w, preferred_element_type=jnp.float32) + b
        if i < num_layers - 1:
            h = jnp.maximum(h, 0.0)       # activation = nn.ReLU()
    o_ref[...] = h.astype(o_ref.dtype)


def _mlp_fused_call(x, params):
    """One pallas_call for the whole MLP."""
    B = x.shape[0]
    num_layers = len(params)
    N_out = params[-1][0].shape[1]

    inputs = [x]
    in_specs = [pl.BlockSpec(x.shape, lambda: (0, 0))]
    for w, b in params:
        inputs.append(w)
        inputs.append(b)
        in_specs.append(pl.BlockSpec(w.shape, lambda: (0, 0)))
        in_specs.append(pl.BlockSpec(b.shape, lambda: (0, 0)))

    kernel = functools.partial(_mlp_fused_kernel, num_layers=num_layers)
    return pl.pallas_call(
        kernel,
        out_shape=jax.ShapeDtypeStruct((B, N_out), x.dtype),
        in_specs=in_specs,
        out_specs=pl.BlockSpec((B, N_out), lambda: (0, 0)),
    )(*inputs)


# Single jitted entry point: one device dispatch for the whole forward pass.
mlp_forward = jax.jit(_mlp_fused_call)


def init_mlp_params(key, in_channels, hidden_channels):
    """Deterministic init mimicking nn.Linear's default U(-1/sqrt(fan_in), ...).

    Biases are stored as (1, N) so no reshape is needed at call time.
    """
    dims = [in_channels] + list(hidden_channels)
    params = []
    for i in range(len(dims) - 1):
        fan_in, fan_out = dims[i], dims[i + 1]
        key, kw, kb = jax.random.split(key, 3)
        bound = 1.0 / jnp.sqrt(jnp.float32(fan_in))
        w = jax.random.uniform(kw, (fan_in, fan_out), jnp.float32, -bound, bound)
        b = jax.random.uniform(kb, (1, fan_out), jnp.float32, -bound, bound)
        params.append((w, b))
    return params


def mlp_reference(x, params):
    """Pure-JAX reference (same math, no Pallas)."""
    n = len(params)
    h = x
    for i, (w, b) in enumerate(params):
        h = h @ w + b
        if i < n - 1:
            h = jnp.maximum(h, 0.0)
    return h


if __name__ == "__main__":
    key = jax.random.PRNGKey(0)
    k_x, k_p = jax.random.split(key)

    batch = 8
    in_channels = 16
    hidden_channels = [32, 32, 8]  # Linear(16,32), ReLU, Linear(32,32), ReLU, Linear(32,8)

    x = jax.random.normal(k_x, (batch, in_channels), jnp.float32)
    params = init_mlp_params(k_p, in_channels, hidden_channels)

    out = mlp_forward(x, params)
    out = jax.block_until_ready(out)

    ref = mlp_reference(x, params)
    assert out.shape == (batch, hidden_channels[-1])
    assert jnp.allclose(out, ref, atol=1e-5, rtol=1e-5)

    print("KERNEL_OK")
</pallas_src>

<mosaic_0001>
module attributes {stable_mosaic.version = 11 : i64} {
  func.func @_mlp_fused_kernel(%arg0: memref<8x16xf32, #tpu.memory_space<vmem>>, %arg1: memref<16x32xf32, #tpu.memory_space<vmem>>, %arg2: memref<1x32xf32, #tpu.memory_space<vmem>>, %arg3: memref<32x32xf32, #tpu.memory_space<vmem>>, %arg4: memref<1x32xf32, #tpu.memory_space<vmem>>, %arg5: memref<32x8xf32, #tpu.memory_space<vmem>>, %arg6: memref<1x8xf32, #tpu.memory_space<vmem>>, %arg7: memref<8x8xf32, #tpu.memory_space<vmem>>) attributes {dimension_semantics = [], scalar_prefetch = 0 : i64, scratch_operands = 0 : i64, tpu.core_type = #tpu.core_type<tc>} {
    %c0 = arith.constant 0 : index
    %c0_0 = arith.constant 0 : index
    %0 = vector.load %arg0[%c0, %c0_0] : memref<8x16xf32, #tpu.memory_space<vmem>>, vector<8x16xf32>
    %c0_1 = arith.constant 0 : index
    %c0_2 = arith.constant 0 : index
    %1 = vector.load %arg1[%c0_1, %c0_2] : memref<16x32xf32, #tpu.memory_space<vmem>>, vector<16x32xf32>
    %c0_3 = arith.constant 0 : index
    %c0_4 = arith.constant 0 : index
    %2 = vector.load %arg2[%c0_3, %c0_4] : memref<1x32xf32, #tpu.memory_space<vmem>>, vector<1x32xf32>
    %cst = arith.constant dense<0.000000e+00> : vector<8x32xf32>
    %3 = tpu.matmul %0, %1, %cst {dimension_numbers = #tpu.dot_dimension_numbers<[1], [0], [0], [1], [0, 0, 1, 1], [], []>} : vector<8x16xf32>, vector<16x32xf32>, vector<8x32xf32> -> vector<8x32xf32>
    %4 = vector.broadcast %2 : vector<1x32xf32> to vector<8x32xf32>
    %5 = arith.addf %3, %4 : vector<8x32xf32>
    %cst_5 = arith.constant 0.000000e+00 : f32
    %6 = vector.broadcast %cst_5 : f32 to vector<8x32xf32>
    %7 = arith.maximumf %5, %6 : vector<8x32xf32>
    %c0_6 = arith.constant 0 : index
    %c0_7 = arith.constant 0 : index
    %8 = vector.load %arg3[%c0_6, %c0_7] : memref<32x32xf32, #tpu.memory_space<vmem>>, vector<32x32xf32>
    %c0_8 = arith.constant 0 : index
    %c0_9 = arith.constant 0 : index
    %9 = vector.load %arg4[%c0_8, %c0_9] : memref<1x32xf32, #tpu.memory_space<vmem>>, vector<1x32xf32>
    %cst_10 = arith.constant dense<0.000000e+00> : vector<8x32xf32>
    %10 = tpu.matmul %7, %8, %cst_10 {dimension_numbers = #tpu.dot_dimension_numbers<[1], [0], [0], [1], [0, 0, 1, 1], [], []>} : vector<8x32xf32>, vector<32x32xf32>, vector<8x32xf32> -> vector<8x32xf32>
    %11 = vector.broadcast %9 : vector<1x32xf32> to vector<8x32xf32>
    %12 = arith.addf %10, %11 : vector<8x32xf32>
    %cst_11 = arith.constant 0.000000e+00 : f32
    %13 = vector.broadcast %cst_11 : f32 to vector<8x32xf32>
    %14 = arith.maximumf %12, %13 : vector<8x32xf32>
    %c0_12 = arith.constant 0 : index
    %c0_13 = arith.constant 0 : index
    %15 = vector.load %arg5[%c0_12, %c0_13] : memref<32x8xf32, #tpu.memory_space<vmem>>, vector<32x8xf32>
    %c0_14 = arith.constant 0 : index
    %c0_15 = arith.constant 0 : index
    %16 = vector.load %arg6[%c0_14, %c0_15] : memref<1x8xf32, #tpu.memory_space<vmem>>, vector<1x8xf32>
    %cst_16 = arith.constant dense<0.000000e+00> : vector<8x8xf32>
    %17 = tpu.matmul %14, %15, %cst_16 {dimension_numbers = #tpu.dot_dimension_numbers<[1], [0], [0], [1], [0, 0, 1, 1], [], []>} : vector<8x32xf32>, vector<32x8xf32>, vector<8x8xf32> -> vector<8x8xf32>
    %18 = vector.broadcast %16 : vector<1x8xf32> to vector<8x8xf32>
    %19 = arith.addf %17, %18 : vector<8x8xf32>
    %c0_17 = arith.constant 0 : index
    %c0_18 = arith.constant 0 : index
    %20 = vector.load %arg7[%c0_17, %c0_18] : memref<8x8xf32, #tpu.memory_space<vmem>>, vector<8x8xf32>
    tpu.vector_store %arg7[%c0_17, %c0_18], %19 {strides = array<i32>} : memref<8x8xf32, #tpu.memory_space<vmem>>, vector<8x8xf32>,
    return
  }
}

</mosaic_0001>

<bundles_post_ra>
// kernel: _mlp_fused_call.1
= control target key start
LH: loop header
LB: loop body
LE: loop exit
PB: predicated region body
PF: predicated region fallthrough
CT: control target
= control target key end

     0   :  { %12 = vsyncpa [#allocation3], 0  ;;  %s541_s0 = inlined_call_operand.vmem [shape: f32[8,16], index: 0, kind: input, shape index: {}]   ;;  %s542_s1 = inlined_call_operand.hbm [shape: f32[16,32], index: 1, kind: input, shape index: {}]   ;;  %s543_s2 = inlined_call_operand.vmem [shape: f32[1,32], index: 2, kind: input, shape index: {}]   ;;  %s544_s3 = inlined_call_operand.vmem [shape: f32[32,32], index: 3, kind: input, shape index: {}]   ;;  %s545_s4 = inlined_call_operand.hbm [shape: f32[1,32], index: 4, kind: input, shape index: {}]   ;;  %s546_s5 = inlined_call_operand.vmem [shape: f32[32,8], index: 5, kind: input, shape index: {}]   ;;  %s547_s6 = inlined_call_operand.vmem [shape: f32[1,8], index: 6, kind: input, shape index: {}]   ;;  %s548_s7 = inlined_call_operand.hbm [shape: f32[8,8], index: 7, kind: output, shape index: {}]  }
   0x1   :  { %13 = vsyncpa [#allocation6], 0 }
   0x2   :  { %14 = vsyncpa [#allocation4], 0  ;;  %s447_s24 = smov [#allocation2]  }
   0x3   :  { %s22_s25 = sshll.u32 %s447_s24, 4  ;;  %s23_s25 = int_to_ptr.vmem [resolvable:$true] %s22_s25 }
   0x4   :  { %s389_s26 = scalar_lea.vmem %s23_s25, 256  ;;  %p394_p1 = scmp.lt.s32.totalorder %s23_s25, %s23_s25 }
   0x5   :  { %p390_p0 = scmp.ne.s32.totalorder %s23_s25, %s389_s26  ;;  %p395_p2 = scmp.lt.s32.totalorder %s389_s26, %s389_s26 }
   0x7   :  { %p396_p3 = por %p395_p2, %p394_p1 }
   0x9   :  { %p397_p4 = pnand %p396_p3, %p390_p0 }
   0xb   :  { %400 = shalt.err (!%p397_p4)
}
   0xc   :  { %s448_s27 = smov 128   ;;  %s449_s28 = smov 8  }
   0xd   :  { %28 = dma.hbm_to_vmem [thread:$0]  %s542_s1, 256, %s23_s25, [#allocation3], %s448_s27, %s448_s27, %s449_s28  }
   0xe   :  { %s450_s8 = smov [#allocation5]  }
   0xf   :  { %s39_s9 = sshll.u32 %s450_s8, 4  ;;  %s40_s9 = int_to_ptr.vmem [resolvable:$true] %s39_s9 }
  0x10   :  { %s409_s10 = scalar_lea.vmem %s40_s9, 16  ;;  %s413_s11 = scalar_lea.vmem %s40_s9, 32 }
  0x11   :  { %p410_p5 = scmp.ne.s32.totalorder %s40_s9, %s409_s10  ;;  %p414_p6 = scmp.lt.s32.totalorder %s40_s9, %s40_s9 }
  0x12   :  { %p415_p7 = scmp.lt.s32.totalorder %s413_s11, %s409_s10 }
  0x14   :  { %p416_p8 = por %p415_p7, %p414_p6 }
  0x16   :  { %p417_p9 = pnand %p416_p8, %p410_p5 }
  0x18   :  { %420 = shalt.err (!%p417_p9)
}
  0x19   :  { %42 = dma.hbm_to_vmem [thread:$0]  %s545_s4, 16, %s40_s9, [#allocation6]  }
  0x1a   :  { %441 = dma.done.wait [#allocation3], 256  }
  0x1b   :  { %442 = vsyncadd [#allocation3], 4294967040 }
  0x1c   :  { %443 = dma.done.wait [#allocation6], 16  }
  0x1d   :  { %444 = vsyncadd [#allocation6], 4294967280  ;;  %v451_v0 = vmov 0.0   ;;  %vm452_vm0 = vmmov 0   ;;  %v55_v1 = vld [vmem:[#allocation2 + $0x8] sm:$0xff]  ;;  %v54_v2 = vld [vmem:[#allocation2] sm:$0xff] }
  0x1e   :  { %345 = vmatprep.subr.mxu0 %v451_v0  ;;  %349 = vmatprep.mubr.msk.f32.mxu0 %vm452_vm0, %v451_v0  ;;  %v53_v3 = vld [vmem:[%s541_s0] sm:$0xff]  ;;  %vm63_vm1 = vcmask 130048   ;;  %v141_v4 = vld [vmem:[%s544_s3 + $0x18] sm:$0xff]  ;;  %v140_v5 = vld [vmem:[%s544_s3 + $0x10] sm:$0xff]  ;;  %vm149_vm2 = vcmask 261120   ;;  %s453_s8 = smov [#allocation7]  }
  0x1f   :  { %352 = vmatprep.subr.mxu1 %v451_v0  ;;  %360 = vmatprep.mubr.msk.f32.mxu1 %vm452_vm0, %v451_v0  ;;  %v139_v6 = vld [vmem:[%s544_s3 + $0x8] sm:$0xff]  ;;  %v138_v7 = vld [vmem:[%s544_s3] sm:$0xff]  ;;  %v227_v8 = vld [vmem:[%s546_s5 + $0x18] sm:$0xff]  ;;  %s316_s9 = sshll.u32 %s453_s8, 4  ;;  %vm308_vm3 = vcmask 64512   ;;  %s317_s9 = int_to_ptr.vmem [resolvable:$true] %s316_s9 }
  0x20   :  { %346 = vmatpush3.msra.mxu0 %v55_v1  ;;  %353 = vmatpush3.msra.mxu1 %v141_v4  ;;  %v326_v9 = vld [vmem:[%s543_s2] ss:$0 sm:$0xff]  ;;  %v226_v14 = vld [vmem:[%s546_s5 + $0x10] sm:$0xff]  ;;  %v225_v15 = vld [vmem:[%s546_s5 + $0x8] sm:$0xff]  ;;  %p426_p11 = scmp.lt.s32.totalorder %s317_s9, %s317_s9 }
  0x21   :  { %347 = vmatprep.subr.mxu0 %v451_v0  ;;  %354 = vmatprep.subr.mxu1 %v451_v0  ;;  %v224_v16 = vld [vmem:[%s546_s5] sm:$0xff]  ;;  %v328_v17 = vld [vmem:[#allocation5] ss:$0 sm:$0xff]  ;;  %s421_s5 = scalar_lea.vmem %s317_s9, 128 }
  0x22   :  { %348 = vmatpush3.msra.mxu0 %v54_v2  ;;  %355 = vmatpush3.msra.mxu1 %v140_v5  ;;  %v330_v22 = vld [vmem:[%s547_s6] ss:$0 sm:$0xff]  ;;  %p422_p10 = scmp.ne.s32.totalorder %s317_s9, %s421_s5  ;;  %p427_p12 = scmp.lt.s32.totalorder %s421_s5, %s421_s5 }
  0x23   :  { %350 = vmatmul.mubr.msk.f32.vlgmr.msra.gmra.mxu0 %vm63_vm1, %v53_v3  ;;  %363 = vmatprep.subr.mxu0 %v451_v0 }
  0x24   :  { %371 = vmatprep.mubr.msk.f32.mxu0 %vm452_vm0, %v451_v0  ;;  %356 = vmatprep.subr.mxu1 %v451_v0  ;;  %p428_p13 = por %p427_p12, %p426_p11 }
  0x25   :  { %357 = vmatpush3.msra.mxu1 %v139_v6  ;;  %364 = vmatpush3.msra.mxu0 %v227_v8 }
  0x26   :  { %358 = vmatprep.subr.mxu1 %v451_v0  ;;  %365 = vmatprep.subr.mxu0 %v451_v0  ;;  %p429_p0 = pnand %p428_p13, %p422_p10 }
  0x27   :  { %359 = vmatpush3.msra.mxu1 %v138_v7  ;;  %366 = vmatpush3.msra.mxu0 %v226_v14 }
  0x28   :  { %367 = vmatprep.subr.mxu0 %v451_v0 }
  0x29   :  { %368 = vmatpush3.msra.mxu0 %v225_v15 }
  0x2a   :  { %369 = vmatprep.subr.mxu0 %v451_v0 }
  0x2b   :  { %370 = vmatpush3.msra.mxu0 %v224_v16 }
  0xe3   :  { %v133_v10 = vpop.f32.mrf.mxu0 }
  0xe4   :  { %v134_v11 = vadd.f32 %v326_v9, %v133_v10 }
  0xe5   :  { %v351_v12 = vpop.f32.mrf.mxu0 }
  0xe6   :  { %v137_v13 = vmax.f32 %v134_v11, 0.0 }
  0xe8   :  { %361 = vmatmul.mubr.msk.f32.vlgmr.msra.gmra.mxu1 %vm149_vm2, %v137_v13 }
 0x1a8   :  { %v219_v18 = vpop.f32.mrf.mxu1 }
 0x1a9   :  { %v220_v19 = vadd.f32 %v328_v17, %v219_v18 }
 0x1aa   :  { %v362_v20 = vpop.f32.mrf.mxu1 }
 0x1ab   :  { %v223_v21 = vmax.f32 %v220_v19, 0.0 }
 0x1ad   :  { %372 = vmatmul.mubr.msk.f32.vlgmr.msra.gmra.mxu0 %vm149_vm2, %v223_v21 }
 0x26d   :  { %v304_v23 = vpop.f32.mrf.mxu0 }
 0x26e   :  { %v305_v24 = vadd.f32 %v330_v22, %v304_v23 }
 0x26f   :  { %v373_v25 = vpop.f32.mrf.mxu0 }
 0x270   :  { %309 = vst.msk [vmem:[#allocation7] sm:$0xff] %vm308_vm3, %v305_v24 }
 0x271   :  { %432 = shalt.err (!%p429_p0)
}
 0x272   :  { %319 = dma.vmem_to_hbm [thread:$0]  %s317_s9, 128, %s548_s7, [#allocation4]  }
 0x273   :  { %445 = dma.done.wait [#allocation4], 128  }
 0x274   :  { %446 = vsyncadd [#allocation4], 4294967168 }
 0x275   :  { %323 = vsyncpa [#allocation3], 1 }
 0x276   :  { %324 = vsyncpa [#allocation6], 1 }
 0x277   :  { %325 = vsyncpa [#allocation4], 1 }

</bundles_post_ra>
